<compile_context>
chip_gen: v5e
topology: v5e:2x2
jax: 0.10.0
libtpu: 0.0.40
codegen_flags: <defaults>
</compile_context>

<pallas_src>
import jax
import jax.numpy as jnp
from jax.experimental import pallas as pl
from jax.experimental.pallas import tpu as pltpu


LAYERS = (64, 32, 16, 8)
MAX_TILE_B = 4096     # rows (lanes) per grid step, upper bound
MIN_TILE_B = 256      # multiple of 128 so the output row is lane-dense
BN_EPS = 1e-5


def _round_up(x, m):
    return (x + m - 1) // m * m


def _choose_tile_b(batch):
    """Lane-tile size: big (amortize ~0.35us/step overhead) but guaranteeing
    >= 2 grid steps for mid/large batches so v7x megacore can split work."""
    padded = _round_up(max(batch, 1), MIN_TILE_B)
    if padded <= MIN_TILE_B:
        return MIN_TILE_B
    half = _round_up((padded + 1) // 2, MIN_TILE_B)
    return min(MAX_TILE_B, half)


def _mlp_layout(feat_dim, widths=LAYERS):
    """Static packing layout for the transposed weights.

    Each entry: (row_off, width, width_pad, k_pad, bias_col).
    W_i^T (width_i x prev_i) lives at wpack[row_off : row_off+width, 0:prev_i];
    width is padded to a multiple of 16 (bf16 sublane tile) with zero rows, and
    the next layer reads k_pad = previous width_pad columns (zero-padded cols
    multiply zero-padded activation rows, contributing nothing).
    """
    layout = []
    row_off = 0
    prev_pad = feat_dim
    for col, width in enumerate(widths):
        width_pad = _round_up(width, 16)
        layout.append((row_off, width, width_pad, prev_pad, col))
        row_off += width_pad
        prev_pad = width_pad
    return tuple(layout), row_off, prev_pad


# ---------------------------------------------------------------------------
# Kernel: 4x (Linear -> ReLU) with BN pre-folded, batch on the lane axis,
# then the final (8 -> 1) linear as a sublane reduction into a lane-dense row.
# ---------------------------------------------------------------------------
def _make_mlp_kernel(layout, n_widths, last_pad):
    def kernel(xt_ref, wpack_ref, misc_ref, out_ref):
        h = xt_ref[...]                                        # (F, tb) bf16
        for (row_off, _width, width_pad, k_pad, col) in layout:
            w = wpack_ref[row_off:row_off + width_pad, 0:k_pad]  # (wp, k) bf16
            b = misc_ref[0:width_pad, col:col + 1]               # (wp, 1) f32
            z = jnp.dot(w, h, preferred_element_type=jnp.float32)  # MXU, f32
            h = jnp.maximum(z + b, 0.0).astype(jnp.bfloat16)       # VPU epilogue

        wf = misc_ref[0:last_pad, n_widths:n_widths + 1]          # (lp, 1) f32
        bf = misc_ref[0:1, n_widths + 1:n_widths + 2]             # (1, 1)  f32
        row = jnp.sum(h.astype(jnp.float32) * wf,
                      axis=0, keepdims=True) + bf                 # (1, tb) f32
        out_ref[0] = row
    return kernel


# ---------------------------------------------------------------------------
# Parameter construction (raw f32, mirroring the PyTorch module) and the
# eval-mode inference fold + packing.
# ---------------------------------------------------------------------------
def make_ncf_params(key, num_users, num_items, embedding_dim, layers=LAYERS):
    params = {}
    keys = iter(jax.random.split(key, 2 + 4 * len(layers) + 2))

    params["user_emb"] = 0.05 * jax.random.normal(
        next(keys), (num_users, embedding_dim), jnp.float32)
    params["item_emb"] = 0.05 * jax.random.normal(
        next(keys), (num_items, embedding_dim), jnp.float32)

    prev = 2 * embedding_dim
    fc = []
    for width in layers:
        bound = 1.0 / float(prev) ** 0.5
        w = jax.random.uniform(next(keys), (prev, width), jnp.float32, -bound, bound)
        b = jax.random.uniform(next(keys), (width,), jnp.float32, -bound, bound)
        gamma = 1.0 + 0.01 * jax.random.normal(next(keys), (width,), jnp.float32)
        beta = 0.01 * jax.random.normal(next(keys), (width,), jnp.float32)
        fc.append(dict(w=w, b=b, gamma=gamma, beta=beta,
                       mean=jnp.zeros((width,), jnp.float32),     # PyTorch BN defaults
                       var=jnp.ones((width,), jnp.float32)))
        prev = width
    params["fc"] = fc

    bound = 1.0 / float(prev) ** 0.5
    params["wf"] = jax.random.uniform(next(keys), (prev, 1), jnp.float32, -bound, bound)
    params["bf"] = jax.random.uniform(next(keys), (1,), jnp.float32, -bound, bound)
    return params


def fold_for_inference(params, eps=BN_EPS):
    """Fold eval-mode BN of layer i into layer i+1 (last BN into the final
    linear); transpose + cast weights to bf16 and pack them into one (R, 128)
    operand; pack all small f32 constants into one (rows, 8) operand."""
    ws, bs = [], []
    pend_scale = pend_shift = None
    for lyr in params["fc"]:
        w, b = lyr["w"], lyr["b"]
        if pend_scale is not None:
            b = pend_shift @ w + b
            w = w * pend_scale[:, None]
        ws.append(w)
        bs.append(b)
        scale = lyr["gamma"] / jnp.sqrt(lyr["var"] + eps)
        pend_scale, pend_shift = scale, lyr["beta"] - lyr["mean"] * scale

    wf = (params["wf"] * pend_scale[:, None])[:, 0]          # (k,)
    bf = pend_shift @ params["wf"] + params["bf"]            # (1,)

    feat = ws[0].shape[0]
    layout, total_rows, _last_pad = _mlp_layout(feat)
    n = len(ws)

    max_k = max(k_pad for (_, _, _, k_pad, _) in layout)
    wpack = jnp.zeros((total_rows, _round_up(max(max_k, feat), 128)), jnp.bfloat16)
    misc_rows = _round_up(max(wp for (_, _, wp, _, _) in layout), 8)
    misc = jnp.zeros((misc_rows, _round_up(n + 2, 8)), jnp.float32)

    for (row_off, width, _wp, _kp, col), w, b in zip(layout, ws, bs):
        wpack = wpack.at[row_off:row_off + width, 0:w.shape[0]].set(
            w.T.astype(jnp.bfloat16))
        misc = misc.at[0:width, col].set(b)
    misc = misc.at[0:wf.shape[0], n].set(wf)
    misc = misc.at[0, n + 1].set(bf[0])

    return {
        "user_emb": params["user_emb"].astype(jnp.bfloat16),
        "item_emb": params["item_emb"].astype(jnp.bfloat16),
        "wpack": wpack,
        "misc": misc,
    }


# ---------------------------------------------------------------------------
# Forward pass (gather / concat / transpose / pad in plain JAX, MLP in kernel).
# ---------------------------------------------------------------------------
@jax.jit
def ncf_forward(prepared, user_input, item_input):
    user_emb = prepared["user_emb"]                   # (U, E) bf16
    item_emb = prepared["item_emb"]                   # (I, E) bf16
    wpack = prepared["wpack"]
    misc = prepared["misc"]

    feat = 2 * user_emb.shape[1]
    batch = user_input.shape[0]
    layout, _total_rows, last_pad = _mlp_layout(feat)
    n_widths = len(LAYERS)

    # Batch-on-lanes input: X^T = (2E, B) bf16, one fused gather+concat+transpose.
    xt = jnp.concatenate([user_emb[user_input],
                          item_emb[item_input]], axis=1).T      # (F, B) bf16

    tile_b = _choose_tile_b(batch)
    b_pad = _round_up(batch, tile_b)
    if b_pad != batch:
        xt = jnp.pad(xt, ((0, 0), (0, b_pad - batch)))
    n_tiles = b_pad // tile_b

    kernel = _make_mlp_kernel(layout, n_widths, last_pad)

    out = pl.pallas_call(
        kernel,
        out_shape=jax.ShapeDtypeStruct((n_tiles, 1, tile_b), jnp.float32),
        grid=(n_tiles,),
        in_specs=[
            pl.BlockSpec((feat, tile_b), lambda i: (0, i)),      # streamed X^T tile
            pl.BlockSpec(wpack.shape, lambda i: (0, 0)),         # resident weights
            pl.BlockSpec(misc.shape, lambda i: (0, 0)),          # resident constants
        ],
        out_specs=pl.BlockSpec((1, 1, tile_b), lambda i: (i, 0, 0)),  # lane-dense row
        compiler_params=pltpu.CompilerParams(
            dimension_semantics=("parallel",)),
    )(xt, wpack, misc)

    return out.reshape(b_pad)[:batch]                 # matches output.squeeze()


# ---------------------------------------------------------------------------
# References.
# ---------------------------------------------------------------------------
def ncf_reference(prepared, user_input, item_input):
    """Pure-JAX forward matching the kernel's precision and packing exactly."""
    user_emb, item_emb = prepared["user_emb"], prepared["item_emb"]
    wpack, misc = prepared["wpack"], prepared["misc"]
    feat = 2 * user_emb.shape[1]
    layout, _tr, last_pad = _mlp_layout(feat)
    n = len(LAYERS)

    h = jnp.concatenate([user_emb[user_input],
                         item_emb[item_input]], axis=1).T       # (F, B) bf16
    for (row_off, _w, width_pad, k_pad, col) in layout:
        w = wpack[row_off:row_off + width_pad, 0:k_pad]
        b = misc[0:width_pad, col:col + 1]
        z = jnp.dot(w, h, preferred_element_type=jnp.float32)
        h = jnp.maximum(z + b, 0.0).astype(jnp.bfloat16)
    wf = misc[0:last_pad, n:n + 1]
    bf = misc[0, n + 1]
    return jnp.sum(h.astype(jnp.float32) * wf, axis=0) + bf


def ncf_reference_f32(params, user_input, item_input, eps=BN_EPS):
    """Full-f32, unfolded eval-mode forward (original module semantics)."""
    x = jnp.concatenate([params["user_emb"][user_input],
                         params["item_emb"][item_input]], axis=1)
    for lyr in params["fc"]:
        x = jnp.maximum(x @ lyr["w"] + lyr["b"], 0.0)
        scale = lyr["gamma"] / jnp.sqrt(lyr["var"] + eps)
        x = (x - lyr["mean"]) * scale + lyr["beta"]
    return jnp.squeeze(x @ params["wf"] + params["bf"], axis=-1)


if __name__ == "__main__":
    num_users, num_items = 50, 40
    embedding_dim = 16
    batch = 8

    key = jax.random.PRNGKey(0)
    k_params, k_user, k_item = jax.random.split(key, 3)

    raw_params = make_ncf_params(k_params, num_users, num_items, embedding_dim)
    prepared = fold_for_inference(raw_params)

    user_input = jax.random.randint(k_user, (batch,), 0, num_users, dtype=jnp.int32)
    item_input = jax.random.randint(k_item, (batch,), 0, num_items, dtype=jnp.int32)

    out = jax.block_until_ready(ncf_forward(prepared, user_input, item_input))
    assert out.shape == (batch,)

    ref = ncf_reference(prepared, user_input, item_input)
    assert jnp.allclose(out, ref, atol=1e-5, rtol=1e-4), (out, ref)

    ref_f32 = ncf_reference_f32(raw_params, user_input, item_input)
    assert jnp.allclose(out, ref_f32, atol=5e-2, rtol=5e-2), (out, ref_f32)

    # Larger, multi-tile batch exercising the grid + padding path (>=2 steps).
    k_u2, k_i2 = jax.random.split(jax.random.PRNGKey(1), 2)
    big = 600
    u2 = jax.random.randint(k_u2, (big,), 0, num_users, dtype=jnp.int32)
    i2 = jax.random.randint(k_i2, (big,), 0, num_items, dtype=jnp.int32)
    out2 = jax.block_until_ready(ncf_forward(prepared, u2, i2))
    ref2 = ncf_reference(prepared, u2, i2)
    assert out2.shape == (big,)
    assert jnp.allclose(out2, ref2, atol=1e-5, rtol=1e-4), \
        float(jnp.max(jnp.abs(out2 - ref2)))

    print("KERNEL_OK")
</pallas_src>

<mosaic_0001>
module attributes {stable_mosaic.version = 11 : i64} {
  func.func @kernel(%arg0: i32, %arg1: memref<32x256xbf16, #tpu.memory_space<vmem>>, %arg2: memref<128x128xbf16, #tpu.memory_space<vmem>>, %arg3: memref<64x8xf32, #tpu.memory_space<vmem>>, %arg4: memref<1x1x256xf32, #tpu.memory_space<vmem>>) attributes {dimension_semantics = [#tpu.dimension_semantics<parallel>], iteration_bounds = array<i64: 1>, scalar_prefetch = 0 : i64, scratch_operands = 0 : i64, tpu.core_type = #tpu.core_type<tc>, window_params = [{transform_indices = @transform_0, window_bounds = array<i64: 32, 256>}, {pipeline_mode = #tpu.pipeline_mode<synchronous>, transform_indices = @transform_1, window_bounds = array<i64: 128, 128>}, {pipeline_mode = #tpu.pipeline_mode<synchronous>, transform_indices = @transform_2, window_bounds = array<i64: 64, 8>}, {transform_indices = @transform_3, window_bounds = array<i64: 1, 1, 256>}]} {
    %c0 = arith.constant 0 : index
    %c0_0 = arith.constant 0 : index
    %0 = vector.load %arg1[%c0, %c0_0] : memref<32x256xbf16, #tpu.memory_space<vmem>>, vector<32x256xbf16>
    %c0_1 = arith.constant 0 : index
    %c0_2 = arith.constant 0 : index
    %1 = vector.load %arg2[%c0_1, %c0_2] : memref<128x128xbf16, #tpu.memory_space<vmem>>, vector<64x32xbf16>
    %c0_3 = arith.constant 0 : index
    %c0_4 = arith.constant 0 : index
    %2 = vector.load %arg3[%c0_3, %c0_4] : memref<64x8xf32, #tpu.memory_space<vmem>>, vector<64x1xf32>
    %cst = arith.constant dense<0.000000e+00> : vector<64x256xf32>
    %3 = tpu.matmul %1, %0, %cst {dimension_numbers = #tpu.dot_dimension_numbers<[1], [0], [0], [1], [0, 0, 1, 1], [], []>} : vector<64x32xbf16>, vector<32x256xbf16>, vector<64x256xf32> -> vector<64x256xf32>
    %4 = vector.broadcast %2 : vector<64x1xf32> to vector<64x256xf32>
    %5 = arith.addf %3, %4 : vector<64x256xf32>
    %cst_5 = arith.constant 0.000000e+00 : f32
    %6 = vector.broadcast %cst_5 : f32 to vector<64x256xf32>
    %7 = arith.maximumf %5, %6 : vector<64x256xf32>
    %8 = arith.truncf %7 : vector<64x256xf32> to vector<64x256xbf16>
    %c64 = arith.constant 64 : index
    %c0_6 = arith.constant 0 : index
    %9 = vector.load %arg2[%c64, %c0_6] : memref<128x128xbf16, #tpu.memory_space<vmem>>, vector<32x64xbf16>
    %c0_7 = arith.constant 0 : index
    %c1 = arith.constant 1 : index
    %10 = vector.load %arg3[%c0_7, %c1] : memref<64x8xf32, #tpu.memory_space<vmem>>, vector<32x1xf32>
    %cst_8 = arith.constant dense<0.000000e+00> : vector<32x256xf32>
    %11 = tpu.matmul %9, %8, %cst_8 {dimension_numbers = #tpu.dot_dimension_numbers<[1], [0], [0], [1], [0, 0, 1, 1], [], []>} : vector<32x64xbf16>, vector<64x256xbf16>, vector<32x256xf32> -> vector<32x256xf32>
    %12 = vector.broadcast %10 : vector<32x1xf32> to vector<32x256xf32>
    %13 = arith.addf %11, %12 : vector<32x256xf32>
    %cst_9 = arith.constant 0.000000e+00 : f32
    %14 = vector.broadcast %cst_9 : f32 to vector<32x256xf32>
    %15 = arith.maximumf %13, %14 : vector<32x256xf32>
    %16 = arith.truncf %15 : vector<32x256xf32> to vector<32x256xbf16>
    %c96 = arith.constant 96 : index
    %c0_10 = arith.constant 0 : index
    %17 = vector.load %arg2[%c96, %c0_10] : memref<128x128xbf16, #tpu.memory_space<vmem>>, vector<16x32xbf16>
    %c0_11 = arith.constant 0 : index
    %c2 = arith.constant 2 : index
    %18 = vector.load %arg3[%c0_11, %c2] : memref<64x8xf32, #tpu.memory_space<vmem>>, vector<16x1xf32>
    %cst_12 = arith.constant dense<0.000000e+00> : vector<16x256xf32>
    %19 = tpu.matmul %17, %16, %cst_12 {dimension_numbers = #tpu.dot_dimension_numbers<[1], [0], [0], [1], [0, 0, 1, 1], [], []>} : vector<16x32xbf16>, vector<32x256xbf16>, vector<16x256xf32> -> vector<16x256xf32>
    %20 = vector.broadcast %18 : vector<16x1xf32> to vector<16x256xf32>
    %21 = arith.addf %19, %20 : vector<16x256xf32>
    %cst_13 = arith.constant 0.000000e+00 : f32
    %22 = vector.broadcast %cst_13 : f32 to vector<16x256xf32>
    %23 = arith.maximumf %21, %22 : vector<16x256xf32>
    %24 = arith.truncf %23 : vector<16x256xf32> to vector<16x256xbf16>
    %c112 = arith.constant 112 : index
    %c0_14 = arith.constant 0 : index
    %25 = vector.load %arg2[%c112, %c0_14] : memref<128x128xbf16, #tpu.memory_space<vmem>>, vector<16x16xbf16>
    %c0_15 = arith.constant 0 : index
    %c3 = arith.constant 3 : index
    %26 = vector.load %arg3[%c0_15, %c3] : memref<64x8xf32, #tpu.memory_space<vmem>>, vector<16x1xf32>
    %cst_16 = arith.constant dense<0.000000e+00> : vector<16x256xf32>
    %27 = tpu.matmul %25, %24, %cst_16 {dimension_numbers = #tpu.dot_dimension_numbers<[1], [0], [0], [1], [0, 0, 1, 1], [], []>} : vector<16x16xbf16>, vector<16x256xbf16>, vector<16x256xf32> -> vector<16x256xf32>
    %28 = vector.broadcast %26 : vector<16x1xf32> to vector<16x256xf32>
    %29 = arith.addf %27, %28 : vector<16x256xf32>
    %cst_17 = arith.constant 0.000000e+00 : f32
    %30 = vector.broadcast %cst_17 : f32 to vector<16x256xf32>
    %31 = arith.maximumf %29, %30 : vector<16x256xf32>
    %32 = arith.truncf %31 : vector<16x256xf32> to vector<16x256xbf16>
    %c0_18 = arith.constant 0 : index
    %c4 = arith.constant 4 : index
    %33 = vector.load %arg3[%c0_18, %c4] : memref<64x8xf32, #tpu.memory_space<vmem>>, vector<16x1xf32>
    %c0_19 = arith.constant 0 : index
    %c5 = arith.constant 5 : index
    %34 = vector.load %arg3[%c0_19, %c5] : memref<64x8xf32, #tpu.memory_space<vmem>>, vector<1x1xf32>
    %35 = arith.extf %32 : vector<16x256xbf16> to vector<16x256xf32>
    %36 = vector.broadcast %33 : vector<16x1xf32> to vector<16x256xf32>
    %37 = arith.mulf %35, %36 : vector<16x256xf32>
    %cst_20 = arith.constant dense<0.000000e+00> : vector<256xf32>
    %38 = vector.multi_reduction <add>, %37, %cst_20 [0] : vector<16x256xf32> to vector<256xf32>
    %39 = vector.shape_cast %38 : vector<256xf32> to vector<1x256xf32>
    %40 = vector.broadcast %34 : vector<1x1xf32> to vector<1x256xf32>
    %41 = arith.addf %39, %40 : vector<1x256xf32>
    %c0_21 = arith.constant 0 : index
    %c0_22 = arith.constant 0 : index
    %c0_23 = arith.constant 0 : index
    %42 = vector.load %arg4[%c0_21, %c0_22, %c0_23] : memref<1x1x256xf32, #tpu.memory_space<vmem>>, vector<1x1x256xf32>
    %43 = vector.shape_cast %42 : vector<1x1x256xf32> to vector<1x256xf32>
    %44 = vector.shape_cast %41 : vector<1x256xf32> to vector<1x1x256xf32>
    tpu.vector_store %arg4[%c0_21, %c0_22, %c0_23], %44 {strides = array<i32>} : memref<1x1x256xf32, #tpu.memory_space<vmem>>, vector<1x1x256xf32>,
    return
  }
  func.func @transform_0(%arg0: i32) -> (i32, i32) {
    %c0_i32 = arith.constant 0 : i32
    %c0_i32_0 = arith.constant 0 : i32
    return %c0_i32, %arg0 : i32, i32
  }
  func.func @transform_1(%arg0: i32) -> (i32, i32) {
    %c0_i32 = arith.constant 0 : i32
    %c0_i32_0 = arith.constant 0 : i32
    %c0_i32_1 = arith.constant 0 : i32
    return %c0_i32, %c0_i32_0 : i32, i32
  }
  func.func @transform_2(%arg0: i32) -> (i32, i32) {
    %c0_i32 = arith.constant 0 : i32
    %c0_i32_0 = arith.constant 0 : i32
    %c0_i32_1 = arith.constant 0 : i32
    return %c0_i32, %c0_i32_0 : i32, i32
  }
  func.func @transform_3(%arg0: i32) -> (i32, i32, i32) {
    %c0_i32 = arith.constant 0 : i32
    %c0_i32_0 = arith.constant 0 : i32
    %c0_i32_1 = arith.constant 0 : i32
    return %arg0, %c0_i32, %c0_i32_0 : i32, i32, i32
  }
}

</mosaic_0001>

<bundles_post_ra>
// kernel: ncf_forward.1
= control target key start
LH: loop header
LB: loop body
LE: loop exit
PB: predicated region body
PF: predicated region fallthrough
CT: control target
= control target key end

     0   :  { %v563_v3 = vmov 0   ;;  %vm115_vm0 = vcmask 261120   ;;  %v564_v41 = vmov 1   ;;  %vm248_vm1 = vcmask 523264   ;;  %s694_s0 = inlined_call_operand.vmem [shape: bf16[32,256], index: 0, kind: input, shape index: {}]   ;;  %s695_s2 = inlined_call_operand.vmem [shape: f32[64,8], index: 2, kind: input, shape index: {}]   ;;  %s696_s1 = inlined_call_operand.vmem [shape: bf16[128,128], index: 1, kind: input, shape index: {}]   ;;  %s697_s3 = inlined_call_operand.vmem [shape: f32[1,1,256], index: 3, kind: output, shape index: {}]  }
   0x1   :  { %v493_v0 = vld [vmem:[%s694_s0 + $0x10] sm:$0xf]  ;;  %v534_v1 = vld [vmem:[%s694_s0 + $0x14] sm:$0xf0]  ;;  %v533_v2 = vld [vmem:[%s694_s0 + $0x14] sm:$0xf]  ;;  %549 = vset.pattern.permute.xlu0 %v563_v3  ;;  %550 = vset.pattern.permute.xlu1 %v563_v3 }
   0x2   :  { %v494_v4 = vor.u32 %v534_v1, %v493_v0  ;;  %v495_v5 = vld [vmem:[%s694_s0 + $0x18] sm:$0xf0]  ;;  %v33_v6 = vld [vmem:[%s695_s2 + $0x30] sm:$0xff]  ;;  %v485_v7 = vld [vmem:[%s694_s0] sm:$0xf]  ;;  %551 = vset.pattern.permute.xlu2 %v563_v3  ;;  %vm376_vm2 = vcmask 130048  }
   0x3   :  { %v498_v8 = vor.u32 %v533_v2, %v495_v5  ;;  %67 = vperm.xlu0 %549, %v33_v6   ;;  %v532_v9 = vld [vmem:[%s694_s0 + $0x4] sm:$0xf0]  ;;  %v531_v10 = vld [vmem:[%s694_s0 + $0x4] sm:$0xf]  ;;  %v487_v11 = vld [vmem:[%s694_s0 + $0x8] sm:$0xf0] }
   0x4   :  { %134 = vmatpush.bf16.msra.mxu0 %v494_v4  ;;  %v486_v12 = vor.u32 %v532_v9, %v485_v7  ;;  %v31_v13 = vld [vmem:[%s695_s2 + $0x20] sm:$0xff]  ;;  %v490_v14 = vor.u32 %v531_v10, %v487_v11  ;;  %v34_v16 = vld [vmem:[%s695_s2 + $0x38] sm:$0xff]  ;;  %v32_v17 = vld [vmem:[%s695_s2 + $0x28] sm:$0xff]  ;;  %vm455_vm3 = vcmask 1040384  }
   0x5   :  { %163 = vmatpush.bf16.msra.mxu1 %v498_v8  ;;  %57 = vperm.xlu1 %550, %v31_v13   ;;  %v535_v15 = vld [vmem:[%s696_s1] sm:$0xff]  ;;  %v638_v19 = vld [vmem:[%s695_s2 + $0x8] sm:$0xff]  ;;  %v29_v21 = vld [vmem:[%s695_s2 + $0x10] sm:$0xff] }
   0x6   :  { %v633_v18 = vld [vmem:[%s695_s2] sm:$0xff]  ;;  %v536_v20 = vld [vmem:[%s696_s1 + $0x8] sm:$0xff]  ;;  %47 = vperm.xlu2 %551, %v29_v21   ;;  %v30_v22 = vld [vmem:[%s695_s2 + $0x18] sm:$0xff] }
   0x7   :  { %v537_v23 = vld [vmem:[%s696_s1 + $0x10] sm:$0xff]  ;;  %v538_v24 = vld [vmem:[%s696_s1 + $0x18] sm:$0xff] }
   0x8   :  { %135 = vmatpush.bf16.msra.mxu0 %v486_v12 }
   0x9   :  { %164 = vmatpush.bf16.msra.mxu1 %v490_v14 }
   0xb   :  { %499 = vmatmul.msk.bf16.vlgmr.msra.gmra.mxu0 %vm115_vm0, %v535_v15  ;;  %72 = vperm.xlu0 %549, %v34_v16  }
   0xc   :  { %503 = vmatmul.msk.bf16.vlgmr.msra.gmra.mxu1 %vm115_vm0, %v535_v15 }
   0xd   :  { %62 = vperm.xlu1 %550, %v32_v17  }
   0xe   :  { %52 = vperm.xlu2 %551, %v30_v22  }
  0x13   :  { %37 = vperm.xlu0 %549, %v633_v18  }
  0x15   :  { %42 = vperm.xlu1 %550, %v638_v19  }
  0x16   :  { %552 = vset.pattern.permute.xlu2 %v564_v41 }
  0x17   :  { %230 = vperm.xlu2 %552, %v29_v21  }
  0x1b   :  { %500 = vmatmul.msk.bf16.gmra.mxu0 %vm115_vm0, %v536_v20  ;;  %553 = vset.pattern.permute.xlu0 %v564_v41 }
  0x1c   :  { %504 = vmatmul.msk.bf16.gmra.mxu1 %vm115_vm0, %v536_v20  ;;  %235 = vperm.xlu0 %553, %v30_v22  }
  0x1d   :  { %554 = vset.pattern.permute.xlu1 %v564_v41 }
  0x1e   :  { %220 = vperm.xlu1 %554, %v633_v18  }
  0x1f   :  { %225 = vperm.xlu2 %552, %v638_v19  }
  0x2b   :  { %501 = vmatmul.msk.bf16.gmra.mxu0 %vm115_vm0, %v537_v23 }
  0x2c   :  { %505 = vmatmul.msk.bf16.gmra.mxu1 %vm115_vm0, %v537_v23 }
  0x3b   :  { %502 = vmatmul.msk.bf16.gmra.mxu0 %vm115_vm0, %v538_v24 }
  0x3c   :  { %506 = vmatmul.msk.bf16.gmra.mxu1 %vm115_vm0, %v538_v24 }
  0x60   :  { %v48_v39 = vpop.permute.xlu2 %47 }
  0x68   :  { %v53_v51 = vpop.permute.xlu2 %52 }
  0x75   :  { %v68_v38 = vpop.permute.xlu0 %67 }
  0x77   :  { %v58_v37 = vpop.permute.xlu1 %57 }
  0x7d   :  { %v73_v44 = vpop.permute.xlu0 %72 }
  0x7f   :  { %v63_v43 = vpop.permute.xlu1 %62 }
  0x85   :  { %v38_v5 = vpop.permute.xlu0 %37 }
  0x87   :  { %v43_v63 = vpop.permute.xlu1 %42 }
  0x88   :  { %v137_v25 = vpop.f32.mrf.mxu0 }
  0x89   :  { %v663_v26 = vpop.f32.mrf.mxu1  ;;  %v138_v14 = vadd.f32 %v137_v25, %v38_v5  ;;  %v539_v25 = vld [vmem:[%s696_s1 + $0x20] sm:$0xff] }
  0x8a   :  { %v167_v16 = vadd.f32 %v663_v26, %v38_v5  ;;  %v540_v26 = vld [vmem:[%s696_s1 + $0x28] sm:$0xff] }
  0x8b   :  { %v186_v24 = vmax.f32 %v138_v14, 0.0 }
  0x90   :  { %v139_v27 = vpop.f32.mrf.mxu0  ;;  %v221_v41 = vpop.permute.xlu1 %220 }
  0x91   :  { %v168_v28 = vpop.f32.mrf.mxu1  ;;  %v140_v8 = vadd.f32 %v139_v27, %v43_v63 }
  0x92   :  { %v169_v11 = vadd.f32 %v168_v28, %v43_v63  ;;  %v541_v63 = vld [vmem:[%s696_s1 + $0x30] sm:$0xff] }
  0x93   :  { %v188_v20 = vmax.f32 %v140_v8, 0.0 }
  0x94   :  { %v189_v22 = vmax.f32 %v169_v11, 0.0 }
  0x95   :  { %v202_v27 = vpack.c.bf16 %v188_v20, %v186_v24 }
  0x98   :  { %v142_v29 = vpop.f32.mrf.mxu0 }
  0x99   :  { %v171_v30 = vpop.f32.mrf.mxu1  ;;  %v143_v3 = vadd.f32 %v142_v29, %v48_v39  ;;  %v187_v29 = vmax.f32 %v167_v16, 0.0 }
  0x9a   :  { %v172_v6 = vadd.f32 %v171_v30, %v48_v39  ;;  %v236_v39 = vpop.permute.xlu0 %235 }
  0x9b   :  { %v190_v15 = vmax.f32 %v143_v3, 0.0  ;;  %v203_v30 = vpack.c.bf16 %v189_v22, %v187_v29  ;;  %v568_v3 = vmov 5  }
  0x9c   :  { %v191_v17 = vmax.f32 %v172_v6, 0.0 }
  0xa0   :  { %v144_v31 = vpop.f32.mrf.mxu0 }
  0xa1   :  { %v173_v32 = vpop.f32.mrf.mxu1  ;;  %v145_v60 = vadd.f32 %v144_v31, %v53_v51 }
  0xa2   :  { %v174_v0 = vadd.f32 %v173_v32, %v53_v51 }
  0xa3   :  { %v192_v9 = vmax.f32 %v145_v60, 0.0 }
  0xa4   :  { %v193_v12 = vmax.f32 %v174_v0, 0.0  ;;  %v566_v0 = vmov 3  }
  0xa5   :  { %v204_v21 = vpack.c.bf16 %v192_v9, %v190_v15  ;;  %557 = vset.pattern.permute.xlu0 %v566_v0 }
  0xa6   :  { %v205_v23 = vpack.c.bf16 %v193_v12, %v191_v17  ;;  %364 = vperm.xlu0 %557, %v633_v18  }
  0xa8   :  { %v147_v33 = vpop.f32.mrf.mxu0 }
  0xa9   :  { %v176_v34 = vpop.f32.mrf.mxu1  ;;  %v148_v54 = vadd.f32 %v147_v33, %v58_v37  ;;  %v565_v33 = vmov 2  }
  0xaa   :  { %v177_v57 = vadd.f32 %v176_v34, %v58_v37  ;;  %555 = vset.pattern.permute.xlu1 %v565_v33  ;;  %556 = vset.pattern.permute.xlu2 %v565_v33 }
  0xab   :  { %v194_v4 = vmax.f32 %v148_v54, 0.0  ;;  %311 = vperm.xlu1 %555, %v633_v18   ;;  %316 = vperm.xlu2 %556, %v638_v19  }
  0xac   :  { %v195_v7 = vmax.f32 %v177_v57, 0.0 }
  0xae   :  { %562 = vset.pattern.permute.xlu0 %v568_v3 }
  0xb0   :  { %v149_v35 = vpop.f32.mrf.mxu0 }
  0xb1   :  { %v178_v36 = vpop.f32.mrf.mxu1  ;;  %v150_v48 = vadd.f32 %v149_v35, %v63_v43  ;;  %v231_v35 = vpop.permute.xlu2 %230 }
  0xb2   :  { %v179_v52 = vadd.f32 %v178_v36, %v63_v43 }
  0xb3   :  { %v196_v61 = vmax.f32 %v150_v48, 0.0  ;;  %558 = vset.pattern.permute.xlu1 %v566_v0 }
  0xb4   :  { %v197_v1 = vmax.f32 %v179_v52, 0.0  ;;  %368 = vperm.xlu1 %558, %v638_v19  }
  0xb5   :  { %v206_v10 = vpack.c.bf16 %v196_v61, %v194_v4 }
  0xb6   :  { %v207_v13 = vpack.c.bf16 %v197_v1, %v195_v7  ;;  %v567_v1 = vmov 4  }
  0xb7   :  { %559 = vset.pattern.permute.xlu2 %v567_v1 }
  0xb8   :  { %v152_v40 = vpop.f32.mrf.mxu0  ;;  %420 = vperm.xlu2 %559, %v633_v18  }
  0xb9   :  { %v181_v42 = vpop.f32.mrf.mxu1  ;;  %v153_v45 = vadd.f32 %v152_v40, %v68_v38 }
  0xba   :  { %v182_v46 = vadd.f32 %v181_v42, %v68_v38  ;;  %v226_v38 = vpop.permute.xlu2 %225 }
  0xbb   :  { %v198_v55 = vmax.f32 %v153_v45, 0.0 }
  0xbc   :  { %v199_v58 = vmax.f32 %v182_v46, 0.0  ;;  %560 = vset.pattern.permute.xlu1 %v567_v1 }
  0xbd   :  { %424 = vperm.xlu1 %560, %v638_v19   ;;  %v542_v19 = vld [vmem:[%s696_s1 + $0x38] sm:$0xff] }
  0xc0   :  { %v154_v47 = vpop.f32.mrf.mxu0  ;;  %561 = vset.pattern.permute.xlu2 %v568_v3 }
  0xc1   :  { %v155_v49 = vadd.f32 %v154_v47, %v73_v44  ;;  %v183_v50 = vpop.f32.mrf.mxu1 }
  0xc2   :  { %v184_v53 = vadd.f32 %v183_v50, %v73_v44 }
  0xc3   :  { %v200_v56 = vmax.f32 %v155_v49, 0.0 }
  0xc4   :  { %v201_v59 = vmax.f32 %v184_v53, 0.0 }
  0xc5   :  { %v208_v62 = vpack.c.bf16 %v200_v56, %v198_v55 }
  0xc6   :  { %v209_v2 = vpack.c.bf16 %v201_v59, %v199_v58 }
  0xc7   :  { %259 = vmatpush.bf16.msra.mxu2 %v208_v62 }
  0xc8   :  { %278 = vmatpush.bf16.msra.mxu3 %v209_v2  ;;  %v414_v2 = vld [vmem:[%s695_s2] sm:$0x1] }
  0xc9   :  { %447 = vperm.xlu2 %561, %v414_v2  }
  0xcb   :  { %260 = vmatpush.bf16.msra.mxu2 %v206_v10 }
  0xcc   :  { %279 = vmatpush.bf16.msra.mxu3 %v207_v13 }
  0xcf   :  { %261 = vmatpush.bf16.msra.mxu2 %v204_v21 }
  0xd0   :  { %280 = vmatpush.bf16.msra.mxu3 %v205_v23 }
  0xd3   :  { %262 = vmatpush.bf16.msra.mxu2 %v202_v27 }
  0xd4   :  { %281 = vmatpush.bf16.msra.mxu3 %v203_v30 }
  0xd6   :  { %515 = vmatmul.msk.bf16.vlgmr.msra.gmra.mxu2 %vm248_vm1, %v539_v25 }
  0xd7   :  { %517 = vmatmul.msk.bf16.vlgmr.msra.gmra.mxu3 %vm248_vm1, %v539_v25 }
  0xe6   :  { %516 = vmatmul.msk.bf16.gmra.mxu2 %vm248_vm1, %v540_v26 }
  0xe7   :  { %518 = vmatmul.msk.bf16.gmra.mxu3 %vm248_vm1, %v540_v26 }
 0x105   :  { %v317_v7 = vpop.permute.xlu2 %316 }
 0x118   :  { %v365_v21 = vpop.permute.xlu0 %364 }
 0x11d   :  { %v312_v6 = vpop.permute.xlu1 %311 }
 0x126   :  { %v369_v27 = vpop.permute.xlu1 %368 }
 0x159   :  { %v264_v28 = vpop.f32.mrf.mxu2 }
 0x15a   :  { %v283_v31 = vpop.f32.mrf.mxu3  ;;  %v265_v49 = vadd.f32 %v264_v28, %v221_v41 }
 0x15b   :  { %v284_v52 = vadd.f32 %v283_v31, %v221_v41 }
 0x15c   :  { %v293_v59 = vmax.f32 %v265_v49, 0.0 }
 0x15d   :  { %v294_v60 = vmax.f32 %v284_v52, 0.0 }
 0x161   :  { %v266_v32 = vpop.f32.mrf.mxu2 }
 0x162   :  { %v285_v34 = vpop.f32.mrf.mxu3  ;;  %v267_v44 = vadd.f32 %v266_v32, %v226_v38 }
 0x163   :  { %v286_v47 = vadd.f32 %v285_v34, %v226_v38 }
 0x164   :  { %v295_v55 = vmax.f32 %v267_v44, 0.0 }
 0x165   :  { %v296_v57 = vmax.f32 %v286_v47, 0.0 }
 0x166   :  { %v301_v61 = vpack.c.bf16 %v295_v55, %v293_v59 }
 0x167   :  { %v302_v62 = vpack.c.bf16 %v296_v57, %v294_v60  ;;  %v458_v60 = vlaneseq }
 0x169   :  { %v269_v36 = vpop.f32.mrf.mxu2  ;;  %vm460_vm4 = vcmp.lt.s32.totalorder %v458_v60, 256 }
 0x16a   :  { %v288_v37 = vpop.f32.mrf.mxu3  ;;  %v270_v40 = vadd.f32 %v269_v36, %v231_v35 }
 0x16b   :  { %v289_v42 = vadd.f32 %v288_v37, %v231_v35 }
 0x16c   :  { %v297_v50 = vmax.f32 %v270_v40, 0.0  ;;  %v425_v40 = vpop.permute.xlu1 %424 }
 0x16d   :  { %v298_v53 = vmax.f32 %v289_v42, 0.0 }
 0x171   :  { %v271_v43 = vpop.f32.mrf.mxu2 }
 0x172   :  { %v272_v45 = vadd.f32 %v271_v43, %v236_v39  ;;  %v290_v46 = vpop.f32.mrf.mxu3 }
 0x173   :  { %v291_v48 = vadd.f32 %v290_v46, %v236_v39  ;;  %v421_v39 = vpop.permute.xlu2 %420 }
 0x174   :  { %v299_v51 = vmax.f32 %v272_v45, 0.0 }
 0x175   :  { %v300_v54 = vmax.f32 %v291_v48, 0.0 }
 0x176   :  { %v303_v56 = vpack.c.bf16 %v299_v51, %v297_v50 }
 0x177   :  { %v304_v58 = vpack.c.bf16 %v300_v54, %v298_v53 }
 0x178   :  { %333 = vmatpush.bf16.msrb.mxu2 %v303_v56 }
 0x179   :  { %347 = vmatpush.bf16.msrb.mxu3 %v304_v58 }
 0x17b   :  { %v448_v59 = vpop.permute.xlu2 %447 }
 0x17c   :  { %334 = vmatpush.bf16.msrb.mxu2 %v301_v61 }
 0x17d   :  { %348 = vmatpush.bf16.msrb.mxu3 %v302_v62 }
 0x17f   :  { %523 = vmatmul.msk.bf16.vlgmr.msrb.gmra.mxu2 %vm115_vm0, %v541_v63 }
 0x180   :  { %524 = vmatmul.msk.bf16.vlgmr.msrb.gmra.mxu3 %vm115_vm0, %v541_v63 }
 0x202   :  { %v336_v4 = vpop.f32.mrf.mxu2 }
 0x203   :  { %v350_v5 = vpop.f32.mrf.mxu3  ;;  %v337_v8 = vadd.f32 %v336_v4, %v312_v6 }
 0x204   :  { %v351_v9 = vadd.f32 %v350_v5, %v312_v6 }
 0x205   :  { %v355_v13 = vmax.f32 %v337_v8, 0.0 }
 0x206   :  { %v356_v15 = vmax.f32 %v351_v9, 0.0 }
 0x20a   :  { %v338_v10 = vpop.f32.mrf.mxu2 }
 0x20b   :  { %v339_v11 = vadd.f32 %v338_v10, %v317_v7  ;;  %v352_v18 = vpop.f32.mrf.mxu3 }
 0x20c   :  { %v353_v12 = vadd.f32 %v352_v18, %v317_v7 }
 0x20d   :  { %v357_v14 = vmax.f32 %v339_v11, 0.0 }
 0x20e   :  { %v358_v16 = vmax.f32 %v353_v12, 0.0 }
 0x20f   :  { %v359_v17 = vpack.c.bf16 %v357_v14, %v355_v13 }
 0x210   :  { %v360_v20 = vpack.c.bf16 %v358_v16, %v356_v15 }
 0x211   :  { %387 = vmatpush.bf16.msra.mxu2 %v359_v17 }
 0x212   :  { %401 = vmatpush.bf16.msra.mxu3 %v360_v20 }
 0x214   :  { %529 = vmatmul.msk.bf16.vlgmr.msra.gmra.mxu2 %vm376_vm2, %v542_v19 }
 0x215   :  { %530 = vmatmul.msk.bf16.vlgmr.msra.gmra.mxu3 %vm376_vm2, %v542_v19 }
 0x297   :  { %v389_v22 = vpop.f32.mrf.mxu2 }
 0x298   :  { %v403_v23 = vpop.f32.mrf.mxu3  ;;  %v390_v24 = vadd.f32 %v389_v22, %v365_v21 }
 0x299   :  { %v404_v29 = vadd.f32 %v403_v23, %v365_v21 }
 0x29a   :  { %v408_v30 = vmax.f32 %v390_v24, 0.0 }
 0x29b   :  { %v409_v25 = vmax.f32 %v404_v29, 0.0 }
 0x29d   :  { %v412_v32 = vpack.c.bf16 %v409_v25, %v408_v30 }
 0x29f   :  { %v391_v26 = vpop.f32.mrf.mxu2  ;;  %v415_v37 = vunpack.c.l.bf16 %v412_v32  ;;  %v416_v38 = vunpack.c.h.bf16 %v412_v32 }
 0x2a0   :  { %v392_v28 = vadd.f32 %v391_v26, %v369_v27  ;;  %v405_v31 = vpop.f32.mrf.mxu3 }
 0x2a1   :  { %v406_v33 = vadd.f32 %v405_v31, %v369_v27  ;;  %v427_v43 = vmul.f32 %v421_v39, %v415_v37  ;;  %v428_v44 = vmul.f32 %v421_v39, %v416_v38 }
 0x2a2   :  { %v410_v34 = vmax.f32 %v392_v28, 0.0 }
 0x2a3   :  { %v411_v35 = vmax.f32 %v406_v33, 0.0 }
 0x2a5   :  { %v413_v36 = vpack.c.bf16 %v411_v35, %v410_v34 }
 0x2a7   :  { %v417_v41 = vunpack.c.l.bf16 %v413_v36  ;;  %v418_v42 = vunpack.c.h.bf16 %v413_v36 }
 0x2a9   :  { %v429_v45 = vmul.f32 %v425_v40, %v417_v41  ;;  %v430_v46 = vmul.f32 %v425_v40, %v418_v42 }
 0x2ab   :  { %v431_v47 = vadd.f32 %v429_v45, %v427_v43  ;;  %v438_v48 = vadd.f32 %v430_v46, %v428_v44 }
 0x2ad   :  { %v432_v49 = vrot.slane %v431_v47, 4  ;;  %v439_v50 = vrot.slane %v438_v48, 4 }
 0x2af   :  { %v433_v51 = vadd.f32 %v432_v49, %v431_v47  ;;  %v440_v52 = vadd.f32 %v439_v50, %v438_v48 }
 0x2b1   :  { %v434_v53 = vrot.slane %v433_v51, 2  ;;  %v441_v54 = vrot.slane %v440_v52, 2 }
 0x2b3   :  { %v435_v55 = vadd.f32 %v434_v53, %v433_v51  ;;  %v442_v56 = vadd.f32 %v441_v54, %v440_v52 }
 0x2b5   :  { %v436_v57 = vrot.slane %v435_v55, 1  ;;  %v443_v58 = vrot.slane %v442_v56, 1 }
 0x2b7   :  { %v437_v61 = vadd.f32 %v436_v57, %v435_v55  ;;  %v444_v62 = vadd.f32 %v443_v58, %v442_v56 }
 0x2b9   :  { %v451_v63 = vadd.f32 %v448_v59, %v444_v62  ;;  %v450_v0 = vadd.f32 %v448_v59, %v437_v61 }
 0x2bb   :  { %v454_v1 = vrot.slane %v451_v63, 7 }
 0x2bd   :  { %v456_v2 = vsel %vm455_vm3, %v450_v0, %v454_v1 }
 0x2be   :  { %462 = vst.msk [vmem:[%s697_s3] sm:$0x3] %vm460_vm4, %v456_v2 }

</bundles_post_ra>
